<compile_context>
chip_gen: v7x
topology: tpu7x:2x2x1
jax: 0.10.0
libtpu: 0.0.40
codegen_flags: <defaults>
</compile_context>

<pallas_src>
import functools

import jax
import jax.numpy as jnp
from jax import lax
from jax.experimental import pallas as pl
from jax.experimental.pallas import tpu as pltpu


def _round_up(x, m):
    return ((x + m - 1) // m) * m


# ----------------------------------------------------------------------------
# Kernel 1: one RelGraphConv layer
#   out = tanh( sum_r A_r @ (H @ W_r) + H @ W_loop )       (h_bias is zeros)
#   A_r[d, s] = sum of edge weights over edges s->d of relation r.
#   grid = (num_relations,): reduction axis, accumulator resident in VMEM.
# ----------------------------------------------------------------------------
def _rgc_kernel(a_ref, h_ref, w_ref, wl_ref, o_ref, acc_ref):
    r = pl.program_id(0)

    @pl.when(r == 0)
    def _init():
        # self-loop term (h_bias is zero-initialised in the reference -> omitted)
        acc_ref[...] = jnp.dot(h_ref[...], wl_ref[...],
                               preferred_element_type=jnp.float32)

    msg = jnp.dot(h_ref[...], w_ref[0], preferred_element_type=jnp.float32)
    acc_ref[...] += jnp.dot(a_ref[0], msg, preferred_element_type=jnp.float32)

    @pl.when(r == pl.num_programs(0) - 1)
    def _finalize():
        o_ref[...] = jnp.tanh(acc_ref[...])


def rel_graph_conv(h, p, src, dst, etype, edge_w):
    """One RelGraphConv layer (+ the tanh KGMC_att applies right after it)."""
    N, din = h.shape
    num_rels, _, dout = p["W"].shape
    n_pad = _round_up(N, 8)

    w_e = (jnp.ones((src.shape[0],), jnp.float32) if edge_w is None
           else edge_w.astype(jnp.float32))
    # dense per-relation weighted adjacency (mathematically exact for fn.sum agg)
    # TODO(synk): for large subgraphs, tile the node axis / use a segment-sum
    # formulation instead of a dense (R, N, N) adjacency.
    adj = jnp.zeros((num_rels, n_pad, n_pad), jnp.float32)
    adj = adj.at[etype, dst, src].add(w_e)
    h_p = jnp.pad(h, ((0, n_pad - N), (0, 0))) if n_pad != N else h

    out = pl.pallas_call(
        _rgc_kernel,
        out_shape=jax.ShapeDtypeStruct((n_pad, dout), jnp.float32),
        grid=(num_rels,),
        in_specs=[
            pl.BlockSpec((1, n_pad, n_pad), lambda r: (r, 0, 0)),
            pl.BlockSpec((n_pad, din), lambda r: (0, 0)),
            pl.BlockSpec((1, din, dout), lambda r: (r, 0, 0)),
            pl.BlockSpec((din, dout), lambda r: (0, 0)),
        ],
        out_specs=pl.BlockSpec((n_pad, dout), lambda r: (0, 0)),
        scratch_shapes=[pltpu.VMEM((n_pad, dout), jnp.float32)],
        compiler_params=pltpu.CompilerParams(
            dimension_semantics=("arbitrary",),
            vmem_limit_bytes=32 * 1024 * 1024),
    )(adj, h_p, p["W"], p["Wl"])
    return out[:N]


# ----------------------------------------------------------------------------
# Kernel 2: classifier_2 MLP with the src/dst row gather fused in-kernel.
#   weights[e] = sigmoid( relu( [h[src_e], h[dst_e]] @ W1 + b1 ) @ W2 + b2 )
#   Output is a lane-dense (1, E_pad) row.
# ----------------------------------------------------------------------------
def _edge_mlp_kernel(src_ref, dst_ref, h_ref, w1a_ref, w1b_ref, b1_ref,
                     w2_ref, b2_ref, o_ref):
    te = src_ref.shape[0]
    n = h_ref.shape[0]
    h = h_ref[...]
    # fused row gather: one-hot (TE, N) @ H (exact: one 1.0 per row)
    lanes = lax.broadcasted_iota(jnp.int32, (te, n), 1)
    u = jnp.dot((lanes == src_ref[...]).astype(jnp.float32), h,
                preferred_element_type=jnp.float32)          # h0[src]  (TE, Dh)
    v = jnp.dot((lanes == dst_ref[...]).astype(jnp.float32), h,
                preferred_element_type=jnp.float32)          # h0[dst]  (TE, Dh)
    hid = (jnp.dot(u, w1a_ref[...], preferred_element_type=jnp.float32)
           + jnp.dot(v, w1b_ref[...], preferred_element_type=jnp.float32)
           + b1_ref[...])
    hid = jnp.maximum(hid, 0.0)                              # ReLU
    logit = jnp.sum(hid * w2_ref[...], axis=1, keepdims=True) + b2_ref[0]
    sig = 1.0 / (1.0 + jnp.exp(-logit))                      # (TE, 1)
    # lane-dense output: scatter the (TE, 1) column into a (1, TE) row via a
    # masked sublane reduce (avoids masked vst.msk on a last-dim-1 output).
    sub = lax.broadcasted_iota(jnp.int32, (te, te), 0)
    lane = lax.broadcasted_iota(jnp.int32, (te, te), 1)
    o_ref[...] = jnp.sum(jnp.where(sub == lane, sig, 0.0), axis=0, keepdims=True)


def edge_classifier(h, src_idx, dst_idx, p, *, edge_tile=512):
    """classifier_2: sigmoid(Linear(ReLU(Linear(cat([h[src], h[dst]], 1)))))."""
    N, dh = h.shape
    E = int(src_idx.shape[0])
    te = min(_round_up(max(E, 1), 128), edge_tile)
    e_pad = _round_up(max(E, 1), te)
    n_pad = _round_up(N, 8)

    h_p = jnp.pad(h, ((0, n_pad - N), (0, 0))) if n_pad != N else h
    src_col = jnp.full((e_pad, 1), -1, jnp.int32).at[:E, 0].set(src_idx.astype(jnp.int32))
    dst_col = jnp.full((e_pad, 1), -1, jnp.int32).at[:E, 0].set(dst_idx.astype(jnp.int32))

    w1a = p["W1"][:dh]                      # (Dh, 64) -> multiplies h[src]
    w1b = p["W1"][dh:]                      # (Dh, 64) -> multiplies h[dst]
    b1 = p["b1"].reshape(1, -1)             # (1, 64)
    w2 = p["W2"].reshape(1, -1)             # (1, 64)
    b2 = p["b2"].reshape((1,)).astype(jnp.float32)

    # TODO(synk): also tile the node axis if the enclosing subgraph gets large.
    out = pl.pallas_call(
        _edge_mlp_kernel,
        out_shape=jax.ShapeDtypeStruct((1, e_pad), jnp.float32),
        grid=(e_pad // te,),
        in_specs=[
            pl.BlockSpec((te, 1), lambda e: (e, 0)),
            pl.BlockSpec((te, 1), lambda e: (e, 0)),
            pl.BlockSpec((n_pad, dh), lambda e: (0, 0)),
            pl.BlockSpec((dh, 64), lambda e: (0, 0)),
            pl.BlockSpec((dh, 64), lambda e: (0, 0)),
            pl.BlockSpec((1, 64), lambda e: (0, 0)),
            pl.BlockSpec((1, 64), lambda e: (0, 0)),
            pl.BlockSpec(memory_space=pltpu.MemorySpace.SMEM),
        ],
        out_specs=pl.BlockSpec((1, te), lambda e: (0, e)),
        compiler_params=pltpu.CompilerParams(
            dimension_semantics=("parallel",),
            vmem_limit_bytes=32 * 1024 * 1024),
    )(src_col, dst_col, h_p, w1a, w1b, b1, w2, b2)
    return out[0, :E]


# ----------------------------------------------------------------------------
# Kernel 3: final user/item pair scoring with the row gather fused in-kernel.
#   preds[p] = sigmoid( cs[uidx[p]] @ Wu + cs[iidx[p]] @ Wi + b ) * multiply_by
#   grid = (pair tiles [parallel], node tiles [reduction]); pairs on the lane
#   axis -> lane-dense (1, P_pad) output.
# ----------------------------------------------------------------------------
def _pair_score_kernel(u_ref, i_ref, cs_ref, wu_ref, wi_ref, b_ref,
                       o_ref, acc_ref, *, multiply_by):
    k = pl.program_id(1)
    tn = cs_ref.shape[0]
    tp = u_ref.shape[1]

    @pl.when(k == 0)
    def _init():
        acc_ref[...] = jnp.zeros_like(acc_ref)

    cs = cs_ref[...]
    # per-node projections onto the user / item halves of lin2's weight
    pu = jnp.sum(cs * wu_ref[...], axis=1, keepdims=True)     # (TN, 1)
    pi = jnp.sum(cs * wi_ref[...], axis=1, keepdims=True)     # (TN, 1)
    # fused gather: pairs live on the lane axis, nodes on the sublane axis
    node_ids = k * tn + lax.broadcasted_iota(jnp.int32, (tn, tp), 0)
    su = jnp.sum(jnp.where(node_ids == u_ref[...], pu, 0.0), axis=0, keepdims=True)
    si = jnp.sum(jnp.where(node_ids == i_ref[...], pi, 0.0), axis=0, keepdims=True)
    acc_ref[...] += su + si

    @pl.when(k == pl.num_programs(1) - 1)
    def _finalize():
        s = acc_ref[...] + b_ref[0]
        # sigmoid with the reciprocal on the EUP (output-only path -> approx ok)
        o_ref[...] = multiply_by * pl.reciprocal(1.0 + jnp.exp(-s), approx=True)


def pair_scores(cs, uidx, iidx, lin2, *, multiply_by=1, pair_tile=512, node_tile=1024):
    """sigmoid(cat([cs[uidx], cs[iidx]], 1) @ lin2.W + lin2.b) * multiply_by."""
    N, D = cs.shape
    P = int(uidx.shape[0])
    tp = min(_round_up(max(P, 1), 128), pair_tile)
    p_pad = _round_up(max(P, 1), tp)
    tn = min(_round_up(N, 8), node_tile)
    n_pad = _round_up(N, tn)

    # only tiny index rows get padded (-1 never matches a node id); no (P, D)
    # users/items copies are ever materialised in HBM.
    u_row = jnp.full((1, p_pad), -1, jnp.int32).at[0, :P].set(uidx.astype(jnp.int32))
    i_row = jnp.full((1, p_pad), -1, jnp.int32).at[0, :P].set(iidx.astype(jnp.int32))
    cs_p = jnp.pad(cs, ((0, n_pad - N), (0, 0))) if n_pad != N else cs

    wu = lin2["W"][:D, 0].reshape(1, D)
    wi = lin2["W"][D:, 0].reshape(1, D)
    b = lin2["b"].reshape((1,)).astype(jnp.float32)

    kernel = functools.partial(_pair_score_kernel, multiply_by=float(multiply_by))
    # VMEM/step ~= 2 buffers * (tn*D + 2*tp) * 4B (<~1 MiB at default tiles),
    # well inside v5e (16 MiB) / v6e / v7x (32 MiB) scoped-VMEM budgets.
    out = pl.pallas_call(
        kernel,
        out_shape=jax.ShapeDtypeStruct((1, p_pad), jnp.float32),
        grid=(p_pad // tp, n_pad // tn),     # pairs: parallel, nodes: reduction
        in_specs=[
            pl.BlockSpec((1, tp), lambda i, k: (0, i)),
            pl.BlockSpec((1, tp), lambda i, k: (0, i)),
            pl.BlockSpec((tn, D), lambda i, k: (k, 0)),
            pl.BlockSpec((1, D), lambda i, k: (0, 0)),
            pl.BlockSpec((1, D), lambda i, k: (0, 0)),
            pl.BlockSpec(memory_space=pltpu.MemorySpace.SMEM),
        ],
        out_specs=pl.BlockSpec((1, tp), lambda i, k: (0, i)),
        scratch_shapes=[pltpu.VMEM((1, tp), jnp.float32)],
        compiler_params=pltpu.CompilerParams(
            dimension_semantics=("parallel", "arbitrary"),
            vmem_limit_bytes=32 * 1024 * 1024),
    )(u_row, i_row, cs_p, wu, wi, b)
    return out[0, :P]


# ----------------------------------------------------------------------------
# Host-side glue + forward (semantics of KGMC_att.forward, inference path)
# ----------------------------------------------------------------------------
def _minmax(w):
    return (w - w.min()) / (w.max() - w.min() + 1e-8)


def _local_edge_indices(graph):
    # mirrors the reference's python-side node_id -> local-index map (host glue)
    index_map = {}
    for i, v in enumerate(graph["node_id"].tolist()):
        if v not in index_map:
            index_map[v] = i
    src_idx = jnp.asarray([index_map.get(v, 1) for v in graph["original_src_idx"].tolist()],
                          jnp.int32)
    dst_idx = jnp.asarray([index_map.get(v, 1) for v in graph["original_dst_idx"].tolist()],
                          jnp.int32)
    return src_idx, dst_idx


def kgmc_att_forward(params, graph, *, multiply_by=1):
    """Returns (preds, all_edge_mask), like the reference forward."""
    # TODO(synk): DropEdge / F.dropout branches are training-only -> not implemented.
    x = graph["x"].astype(jnp.float32)
    etype = graph["etype"].astype(jnp.int32)   # reference casts to float; used as relation idx
    src = graph["src"].astype(jnp.int32)       # local subgraph edge endpoints
    dst = graph["dst"].astype(jnp.int32)
    src_idx, dst_idx = _local_edge_indices(graph)

    all_edge_mask = []
    concat_states = []

    # ---- layer 0 (no edge weights yet) ----
    h = rel_graph_conv(x, params["rgc"][0], src, dst, etype, edge_w=None)
    concat_states.append(h)

    # ---- edge-weight block 1 (layer-0 features) ----
    ew = edge_classifier(concat_states[0], src_idx, dst_idx, params["classifier_2"])
    w = _minmax(ew)
    all_edge_mask.append(w)

    # ---- layer 1 ----
    h = rel_graph_conv(h, params["rgc"][1], src, dst, etype, edge_w=w)
    concat_states.append(h)

    # ---- edge-weight block 2: th.cat(concat_states) stacks along dim 0, so the
    #      gathered rows are still the layer-0 features (identical inputs) ----
    ew = edge_classifier(concat_states[0], src_idx, dst_idx, params["classifier_2"])
    w = _minmax(ew)
    all_edge_mask.append(w)

    # ---- layer 2 ----
    h = rel_graph_conv(h, params["rgc"][2], src, dst, etype, edge_w=w)
    concat_states.append(h)

    # ---- edge-weight block 3: reference reuses block-2's edges_weights ----
    w = _minmax(ew)
    all_edge_mask.append(w)

    # ---- layer 3 ----
    h = rel_graph_conv(h, params["rgc"][3], src, dst, etype, edge_w=w)
    concat_states.append(h)

    cs = jnp.concatenate(concat_states, axis=1)            # (N, sum(latent_dims))

    # data-dependent user/item selection (eager host glue, as in the reference)
    uidx = jnp.nonzero(graph["nlabel"][:, 0] == 1)[0]
    iidx = jnp.nonzero(graph["nlabel"][:, 1] == 1)[0]
    assert int(uidx.shape[0]) == int(iidx.shape[0]), "user/item count mismatch"

    preds = pair_scores(cs, uidx, iidx, params["lin2"], multiply_by=multiply_by)
    return preds, all_edge_mask


# ----------------------------------------------------------------------------
# Deterministic parameter init (only parameters the forward actually uses;
# attentions_*, classifier_0/1/3, mean/log_std layers, lin1 and the conv biases
# are dead code / zeros in the reference forward).
# ----------------------------------------------------------------------------
def init_params(key, in_feats, latent_dim=(32, 32, 32, 32), num_relations=8):
    keys = iter(jax.random.split(key, 16))

    def mat(shape, fan_in):
        return jax.random.normal(next(keys), shape, jnp.float32) / jnp.sqrt(float(fan_in))

    dims = (in_feats,) + tuple(latent_dim)
    rgc = []
    for l in range(4):
        din, dout = dims[l], dims[l + 1]
        rgc.append({
            "W": mat((num_relations, din, dout), din),   # TypedLinear per-relation weights
            "Wl": mat((din, dout), din),                 # self-loop weight
        })
    d0 = 2 * latent_dim[0]
    classifier_2 = {
        "W1": mat((d0, 64), d0), "b1": mat((64,), d0),
        "W2": mat((64, 1), 64), "b2": mat((1,), 64),
    }
    dlin = 2 * sum(latent_dim)
    lin2 = {"W": mat((dlin, 1), dlin), "b": mat((1,), dlin)}   # regression=True path
    return {"rgc": rgc, "classifier_2": classifier_2, "lin2": lin2}


# ----------------------------------------------------------------------------
# Pure-JAX reference (independent formulation) for a sanity check
# ----------------------------------------------------------------------------
def _ref_rel_graph_conv(h, p, src, dst, etype, edge_w):
    w_e = jnp.ones((src.shape[0],), jnp.float32) if edge_w is None else edge_w
    msg = jnp.einsum("ei,eio->eo", h[src], p["W"][etype]) * w_e[:, None]
    agg = jnp.zeros((h.shape[0], p["W"].shape[-1]), jnp.float32).at[dst].add(msg)
    return jnp.tanh(agg + h @ p["Wl"])


def _ref_edge_classifier(h, src_idx, dst_idx, p):
    ae = jnp.concatenate([h[src_idx], h[dst_idx]], axis=1)
    hid = jax.nn.relu(ae @ p["W1"] + p["b1"])
    return jax.nn.sigmoid(hid @ p["W2"] + p["b2"])[:, 0]


def _ref_forward(params, graph, *, multiply_by=1):
    x = graph["x"].astype(jnp.float32)
    etype = graph["etype"].astype(jnp.int32)
    src = graph["src"].astype(jnp.int32)
    dst = graph["dst"].astype(jnp.int32)
    src_idx, dst_idx = _local_edge_indices(graph)

    masks, states = [], []
    h = _ref_rel_graph_conv(x, params["rgc"][0], src, dst, etype, None)
    states.append(h)
    ew = _ref_edge_classifier(states[0], src_idx, dst_idx, params["classifier_2"])
    w = _minmax(ew); masks.append(w)
    h = _ref_rel_graph_conv(h, params["rgc"][1], src, dst, etype, w)
    states.append(h)
    ew = _ref_edge_classifier(states[0], src_idx, dst_idx, params["classifier_2"])
    w = _minmax(ew); masks.append(w)
    h = _ref_rel_graph_conv(h, params["rgc"][2], src, dst, etype, w)
    states.append(h)
    w = _minmax(ew); masks.append(w)
    h = _ref_rel_graph_conv(h, params["rgc"][3], src, dst, etype, w)
    states.append(h)
    cs = jnp.concatenate(states, axis=1)
    uidx = jnp.nonzero(graph["nlabel"][:, 0] == 1)[0]
    iidx = jnp.nonzero(graph["nlabel"][:, 1] == 1)[0]
    xcat = jnp.concatenate([cs[uidx], cs[iidx]], axis=1)
    preds = jax.nn.sigmoid(xcat @ params["lin2"]["W"] + params["lin2"]["b"])[:, 0]
    return preds * multiply_by, masks


if __name__ == "__main__":
    key = jax.random.PRNGKey(0)
    in_feats = 16
    N, E, R = 16, 24, 8

    k_src, k_dst, k_et, k_x, k_p = jax.random.split(key, 5)
    # small bipartite-ish subgraph: nodes 0..7 are "users", 8..15 are "items"
    src = jax.random.randint(k_src, (E,), 0, 8)
    dst = jax.random.randint(k_dst, (E,), 8, N)
    etype = jax.random.randint(k_et, (E,), 0, R)
    x = jax.random.normal(k_x, (N, in_feats), jnp.float32)

    nlabel = jnp.zeros((N, 2), jnp.int32).at[:8, 0].set(1).at[8:, 1].set(1)
    node_id = jnp.arange(N, dtype=jnp.int32) + 100      # synthetic "original" node ids
    graph = {
        "x": x, "nlabel": nlabel, "node_id": node_id,
        "src": src, "dst": dst, "etype": etype,
        "original_src_idx": node_id[src], "original_dst_idx": node_id[dst],
    }

    params = init_params(k_p, in_feats, num_relations=R)

    preds, edge_masks = kgmc_att_forward(params, graph)
    preds = jax.block_until_ready(preds)
    edge_masks = [jax.block_until_ready(m) for m in edge_masks]

    # sanity checks against a pure-JAX reference (loose tolerance accounts for
    # MXU pass precision and the approx EUP reciprocal on the output sigmoid)
    ref_preds, ref_masks = _ref_forward(params, graph)
    assert preds.shape == (8,) and len(edge_masks) == 3
    for m, rm in zip(edge_masks, ref_masks):
        assert m.shape == (E,)
        assert jnp.allclose(m, rm, atol=5e-2), (m, rm)
    assert jnp.allclose(preds, ref_preds, atol=5e-2), (preds, ref_preds)
    assert bool(jnp.all(jnp.isfinite(preds)))
    assert bool(jnp.all((preds >= 0.0) & (preds <= 1.0 + 1e-3)))

    print("KERNEL_OK")
</pallas_src>

<mosaic_0001>
module attributes {stable_mosaic.version = 11 : i64} {
  func.func @_rgc_kernel(%arg0: i32, %arg1: memref<1x16x16xf32, #tpu.memory_space<vmem>>, %arg2: memref<16x16xf32, #tpu.memory_space<vmem>>, %arg3: memref<1x16x32xf32, #tpu.memory_space<vmem>>, %arg4: memref<16x32xf32, #tpu.memory_space<vmem>>, %arg5: memref<16x32xf32, #tpu.memory_space<vmem>>, %arg6: memref<16x32xf32, #tpu.memory_space<vmem>>) attributes {dimension_semantics = [#tpu.dimension_semantics<arbitrary>], iteration_bounds = array<i64: 8>, scalar_prefetch = 0 : i64, scratch_operands = 1 : i64, tpu.core_type = #tpu.core_type<tc>, window_params = [{transform_indices = @transform_0, window_bounds = array<i64: 1, 16, 16>}, {pipeline_mode = #tpu.pipeline_mode<synchronous>, transform_indices = @transform_1, window_bounds = array<i64: 16, 16>}, {transform_indices = @transform_2, window_bounds = array<i64: 1, 16, 32>}, {pipeline_mode = #tpu.pipeline_mode<synchronous>, transform_indices = @transform_3, window_bounds = array<i64: 16, 32>}, {pipeline_mode = #tpu.pipeline_mode<synchronous>, transform_indices = @transform_4, window_bounds = array<i64: 16, 32>}]} {
    %c0_i32 = arith.constant 0 : i32
    %0 = arith.cmpi eq, %arg0, %c0_i32 : i32
    %1 = arith.extui %0 : i1 to i32
    %c0_i32_0 = arith.constant 0 : i32
    %2 = arith.cmpi ne, %1, %c0_i32_0 : i32
    scf.if %2 {
      %c0_14 = arith.constant 0 : index
      %c0_15 = arith.constant 0 : index
      %16 = vector.load %arg2[%c0_14, %c0_15] : memref<16x16xf32, #tpu.memory_space<vmem>>, vector<16x16xf32>
      %c0_16 = arith.constant 0 : index
      %c0_17 = arith.constant 0 : index
      %17 = vector.load %arg4[%c0_16, %c0_17] : memref<16x32xf32, #tpu.memory_space<vmem>>, vector<16x32xf32>
      %cst_18 = arith.constant dense<0.000000e+00> : vector<16x32xf32>
      %18 = tpu.matmul %16, %17, %cst_18 {dimension_numbers = #tpu.dot_dimension_numbers<[1], [0], [0], [1], [0, 0, 1, 1], [], []>} : vector<16x16xf32>, vector<16x32xf32>, vector<16x32xf32> -> vector<16x32xf32>
      %c0_19 = arith.constant 0 : index
      %c0_20 = arith.constant 0 : index
      %19 = vector.load %arg6[%c0_19, %c0_20] : memref<16x32xf32, #tpu.memory_space<vmem>>, vector<16x32xf32>
      tpu.vector_store %arg6[%c0_19, %c0_20], %18 {strides = array<i32>} : memref<16x32xf32, #tpu.memory_space<vmem>>, vector<16x32xf32>,
    } else {
    }
    %c0 = arith.constant 0 : index
    %c0_1 = arith.constant 0 : index
    %3 = vector.load %arg2[%c0, %c0_1] : memref<16x16xf32, #tpu.memory_space<vmem>>, vector<16x16xf32>
    %c0_2 = arith.constant 0 : index
    %c0_3 = arith.constant 0 : index
    %c0_4 = arith.constant 0 : index
    %4 = vector.load %arg3[%c0_2, %c0_3, %c0_4] : memref<1x16x32xf32, #tpu.memory_space<vmem>>, vector<1x16x32xf32>
    %5 = vector.shape_cast %4 : vector<1x16x32xf32> to vector<16x32xf32>
    %cst = arith.constant dense<0.000000e+00> : vector<16x32xf32>
    %6 = tpu.matmul %3, %5, %cst {dimension_numbers = #tpu.dot_dimension_numbers<[1], [0], [0], [1], [0, 0, 1, 1], [], []>} : vector<16x16xf32>, vector<16x32xf32>, vector<16x32xf32> -> vector<16x32xf32>
    %c0_5 = arith.constant 0 : index
    %c0_6 = arith.constant 0 : index
    %7 = vector.load %arg6[%c0_5, %c0_6] : memref<16x32xf32, #tpu.memory_space<vmem>>, vector<16x32xf32>
    %c0_7 = arith.constant 0 : index
    %c0_8 = arith.constant 0 : index
    %c0_9 = arith.constant 0 : index
    %8 = vector.load %arg1[%c0_7, %c0_8, %c0_9] : memref<1x16x16xf32, #tpu.memory_space<vmem>>, vector<1x16x16xf32>
    %9 = vector.shape_cast %8 : vector<1x16x16xf32> to vector<16x16xf32>
    %cst_10 = arith.constant dense<0.000000e+00> : vector<16x32xf32>
    %10 = tpu.matmul %9, %6, %cst_10 {dimension_numbers = #tpu.dot_dimension_numbers<[1], [0], [0], [1], [0, 0, 1, 1], [], []>} : vector<16x16xf32>, vector<16x32xf32>, vector<16x32xf32> -> vector<16x32xf32>
    %11 = arith.addf %7, %10 : vector<16x32xf32>
    %c0_11 = arith.constant 0 : index
    %c0_12 = arith.constant 0 : index
    %12 = vector.load %arg6[%c0_11, %c0_12] : memref<16x32xf32, #tpu.memory_space<vmem>>, vector<16x32xf32>
    tpu.vector_store %arg6[%c0_11, %c0_12], %11 {strides = array<i32>} : memref<16x32xf32, #tpu.memory_space<vmem>>, vector<16x32xf32>,
    %c7_i32 = arith.constant 7 : i32
    %13 = arith.cmpi eq, %arg0, %c7_i32 : i32
    %14 = arith.extui %13 : i1 to i32
    %c0_i32_13 = arith.constant 0 : i32
    %15 = arith.cmpi ne, %14, %c0_i32_13 : i32
    scf.if %15 {
      %c0_14 = arith.constant 0 : index
      %c0_15 = arith.constant 0 : index
      %16 = vector.load %arg6[%c0_14, %c0_15] : memref<16x32xf32, #tpu.memory_space<vmem>>, vector<16x32xf32>
      %17 = math.tanh %16 : vector<16x32xf32>
      %c0_16 = arith.constant 0 : index
      %c0_17 = arith.constant 0 : index
      %18 = vector.load %arg5[%c0_16, %c0_17] : memref<16x32xf32, #tpu.memory_space<vmem>>, vector<16x32xf32>
      tpu.vector_store %arg5[%c0_16, %c0_17], %17 {strides = array<i32>} : memref<16x32xf32, #tpu.memory_space<vmem>>, vector<16x32xf32>,
    } else {
    }
    return
  }
  func.func @transform_0(%arg0: i32) -> (i32, i32, i32) {
    %c0_i32 = arith.constant 0 : i32
    %c0_i32_0 = arith.constant 0 : i32
    %c0_i32_1 = arith.constant 0 : i32
    return %arg0, %c0_i32, %c0_i32_0 : i32, i32, i32
  }
  func.func @transform_1(%arg0: i32) -> (i32, i32) {
    %c0_i32 = arith.constant 0 : i32
    %c0_i32_0 = arith.constant 0 : i32
    %c0_i32_1 = arith.constant 0 : i32
    return %c0_i32, %c0_i32_0 : i32, i32
  }
  func.func @transform_2(%arg0: i32) -> (i32, i32, i32) {
    %c0_i32 = arith.constant 0 : i32
    %c0_i32_0 = arith.constant 0 : i32
    %c0_i32_1 = arith.constant 0 : i32
    return %arg0, %c0_i32, %c0_i32_0 : i32, i32, i32
  }
  func.func @transform_3(%arg0: i32) -> (i32, i32) {
    %c0_i32 = arith.constant 0 : i32
    %c0_i32_0 = arith.constant 0 : i32
    %c0_i32_1 = arith.constant 0 : i32
    return %c0_i32, %c0_i32_0 : i32, i32
  }
  func.func @transform_4(%arg0: i32) -> (i32, i32) {
    %c0_i32 = arith.constant 0 : i32
    %c0_i32_0 = arith.constant 0 : i32
    %c0_i32_1 = arith.constant 0 : i32
    return %c0_i32, %c0_i32_0 : i32, i32
  }
}

</mosaic_0001>

<bundles_post_ra>
// kernel: tpu_custom_call.1
= control target key start
LH: loop header
LB: loop body
LE: loop exit
PB: predicated region body
PF: predicated region fallthrough
CT: control target
= control target key end

     0   :  { %9 = vsyncpa [#allocation4], 0  ;;  %s1285_s0 = inlined_call_operand.hbm [shape: f32[8,16,16], index: 0, kind: input, shape index: {}]   ;;  %s1286_s1 = inlined_call_operand.hbm [shape: f32[16,16], index: 1, kind: input, shape index: {}]   ;;  %s1287_s2 = inlined_call_operand.hbm [shape: f32[8,16,32], index: 2, kind: input, shape index: {}]   ;;  %s1288_s3 = inlined_call_operand.hbm [shape: f32[16,32], index: 3, kind: input, shape index: {}]   ;;  %s1289_s4 = inlined_call_operand.hbm [shape: f32[16,32], index: 4, kind: output, shape index: {}]  }
   0x1   :  { %11 = vsyncpa [#allocation4 + $0x1], 0 }
   0x2   :  { %12 = vsyncpa [#allocation7], 0 }
   0x3   :  { %13 = vsyncpa [#allocation5], 0  ;;  %s1030_s15 = smov 0   ;;  %s1032_s16 = smov 0  }
   0x4   :  { %s1034_s17 = smov 0   ;;  %s1036_s18 = smov 0  }
   0x5 LB: > { %s1049_s19 = sadd.s32 4294967295, %s994_s18   ;;  %p39_p0 = scmp.ne.s32.totalorder %s986_s16, %s982_s15  ;;  %s994_s18 = sphi %s1036_s18, %s1316_s18   ;;  %s990_s17 = sphi %s1034_s17, %s1315_s17   ;;  %s986_s16 = sphi %s1032_s16, %s1314_s16   ;;  %s982_s15 = sphi %s1030_s15, %s1313_s15  }
   0x6   : > { %p1290_p1 = scmp.eq.s32.totalorder %s1049_s19, 0  ;;  %p648_p2 = scmp.ge.s32.totalorder %s994_s18, 1 }
   0x7   : > { %p139_p3 = scmp.lt.s32.totalorder %s994_s18, 9  ;;  %s996_s22 = smov [#allocation6]  }
   0x8   : > { %p1058_p5 = por %p1290_p1, %p39_p0  ;;  %s151_s23 = sshll.u32 %s996_s22, 4  ;;  %s152_s23 = int_to_ptr.vmem [resolvable:$true] %s151_s23 }
   0x9   : > { %p1062_p6 = pnand %p648_p2, %p139_p3  ;;  %s1075_s25 = sadd.s32 1, %s994_s18  }
   0xa   : > { %s1297_s20 = scalar_select %p1058_p5, 1, 0 }
   0xb   : > { %s1298_s21 = scalar_select %p1062_p6, 1, 0 }
   0xc   : > { %p738_p7 = pneg %p1062_p6  ;;  %s26_s26 = sadd.s32 1, %s990_s17 }
   0xd   : > { %s23_s27 = ssub.s32 %s994_s18, %s1075_s25  ;;  %s802_s30 = scalar_lea.hbm %s1286_s1, 256 }
   0xe   : > { %p1070_p8 = pnand %p738_p7, %p1290_p1  ;;  %p803_p9 = scmp.ne.s32.totalorder %s1286_s1, %s802_s30 }
   0xf   : > { %p809_p13 = scmp.lt.u32.totalorder %s802_s30, %s1286_s1 }
  0x10   : > { %p1293_p10 = pneg %p1070_p8 }
  0x12   : > { %p805_p11 = pnand %p1293_p10, %p803_p9 }
  0x14   : > { %p806_p12 = pneg %p805_p11 }
  0x16   : > { %p811_p0 = pnand %p809_p13, %p806_p12 }
  0x18   : > { %814 = shalt.err (!%p811_p0)
}
  0x19   : > { %s815_s9 = scalar_lea.vmem %s152_s23, 256  ;;  %p823_p4 = scmp.lt.s32.totalorder %s152_s23, %s152_s23 }
  0x1a   : > { %p816_p2 = scmp.ne.s32.totalorder %s152_s23, %s815_s9  ;;  %p824_p1 = scmp.lt.s32.totalorder %s815_s9, %s815_s9 }
  0x1c   : > { %p818_p3 = pnand %p816_p2, %p1293_p10  ;;  %p825_p5 = por %p824_p1, %p823_p4 }
  0x1e   : > { %p819_p7 = pneg %p818_p3 }
  0x20   : > { %p826_p6 = pnand %p825_p5, %p819_p7 }
  0x22   : > { %829 = shalt.err (!%p826_p6)
}
  0x23   : > { %s997_s10 = smov 128   ;;  %s998_s11 = smov 8  }
  0x24   : > { %741 = dma.hbm_to_vmem [thread:$0]  (!%p1070_p8), %s1286_s1, 256, %s152_s23, [#allocation7], %s997_s10, %s997_s10, %s998_s11  }
  0x25   : > { %p24_p1 = scmp.eq.s32.totalorder %s23_s27, 0  ;;  %p33_p4 = scmp.ne.s32.totalorder %s990_s17, %s986_s16 }
  0x26   : > { %p34_p5 = scmp.eq.s32.totalorder %s994_s18, 0  ;;  %p754_p6 = scmp.lt.s32.totalorder %s994_s18, 8 }
  0x27   : > { %s1110_s14 = scalar_select %p24_p1, %s990_s17, %s26_s26  }
  0x28   : > { %p35_p9 = por %p34_p5, %p33_p4  ;;  %s178_s15 = sand.u32 1, %s994_s18  }
  0x29   : > { %s180_s22 = sand.u32 1, %s990_s17   ;;  %s675_s29 = sshll.u32 %s994_s18, 8 }
  0x2a   : > { %s1114_s28 = sshll.u32 %s180_s22, 4  ;;  %s1120_s6 = scalar_lea.hbm %s1285_s0, %s675_s29 }
  0x2b   : > { %s182_s23 = scalar_lea.vmem [#allocation3], %s1114_s28  ;;  %p1123_p11 = pnand %p754_p6, %p35_p9 }
  0x2c   : > { %s189_s27 = sshll.u32 %s182_s23, 4  ;;  %s1132_s8 = scalar_lea.hbm %s1287_s2, %s675_s29  ;;  %s1127_s27 = int_to_ptr.vmem [resolvable:$true] %s189_s27 }
  0x2d   : > { %s1300_s26 = scalar_select %p1123_p11, 1, 0 }
  0x2e   : > { %s1134_s9 = scalar_lea.sflag [#allocation4], %s178_s15  ;;  %s830_s12 = scalar_lea.hbm %s1120_s6, 256 }
  0x2f   : > { %p831_p12 = scmp.ne.s32.totalorder %s1120_s6, %s830_s12  ;;  %p1294_p13 = pneg %p1123_p11 }
  0x30   : > { %s835_s30 = scalar_lea.hbm %s1285_s0, 2048  ;;  %p836_p3 = scmp.lt.u32.totalorder %s1120_s6, %s1285_s0 }
  0x31   : > { %p833_p0 = pnand %p1294_p13, %p831_p12  ;;  %p837_p7 = scmp.lt.u32.totalorder %s835_s30, %s830_s12 }
  0x32   : > { %p839_p4 = scmp.lt.u32.totalorder %s830_s12, %s1120_s6 }
  0x33   : > { %p834_p2 = pneg %p833_p0  ;;  %p838_p1 = por %p837_p7, %p836_p3 }
  0x35   : > { %p840_p5 = por %p839_p4, %p838_p1 }
  0x37   : > { %p841_p6 = pnand %p840_p5, %p834_p2 }
  0x39   : > { %844 = shalt.err (!%p841_p6)
}
  0x3a   : > { %s845_s15 = scalar_lea.vmem %s1127_s27, 256  ;;  %s999_s29 = smov [#allocation3]  }
  0x3b   : > { %p846_p9 = scmp.ne.s32.totalorder %s1127_s27, %s845_s15  ;;  %s850_s18 = sshll.u32 %s999_s29, 4  ;;  %s851_s18 = int_to_ptr.vmem [resolvable:$false] %s850_s18 }
  0x3c   : > { %s852_s7 = scalar_lea.vmem %s851_s18, 512  ;;  %p853_p10 = scmp.lt.s32.totalorder %s1127_s27, %s851_s18 }
  0x3d   : > { %p848_p12 = pnand %p846_p9, %p1294_p13  ;;  %p854_p3 = scmp.lt.s32.totalorder %s852_s7, %s845_s15 }
  0x3f   : > { %p849_p0 = pneg %p848_p12  ;;  %p855_p7 = por %p854_p3, %p853_p10 }
  0x41   : > { %p856_p1 = pnand %p855_p7, %p849_p0 }
  0x43   : > { %859 = shalt.err (!%p856_p1)
}
  0x44   : > { %748 = dma.hbm_to_vmem [thread:$0]  (!%p1123_p11), %s1120_s6, 256, %s1127_s27, %s1134_s9, %s997_s10, %s997_s10, %s998_s11  }
  0x45   : > { %s203_s12 = scalar_lea.vmem [#allocation8], %s1114_s28  ;;  %s1000_s22 = smov [#allocation9]  }
  0x46   : > { %s210_s13 = sshll.u32 %s203_s12, 4  ;;  %s164_s30 = sshll.u32 %s1000_s22, 4  ;;  %s1166_s13 = int_to_ptr.vmem [resolvable:$true] %s210_s13  ;;  %s165_s30 = int_to_ptr.vmem [resolvable:$true] %s164_s30 }
  0x47   : > { %s860_s15 = scalar_lea.hbm %s1288_s3, 256  ;;  %p1301_p2 = pneg %p1070_p8 }
  0x48   : > { %p861_p10 = scmp.ne.s32.totalorder %s1288_s3, %s860_s15  ;;  %p867_p6 = scmp.lt.u32.totalorder %s860_s15, %s1288_s3 }
  0x4a   : > { %p863_p4 = pnand %p861_p10, %p1301_p2 }
  0x4c   : > { %p864_p5 = pneg %p863_p4 }
  0x4e   : > { %p869_p9 = pnand %p867_p6, %p864_p5 }
  0x50   : > { %872 = shalt.err (!%p869_p9)
}
  0x51   : > { %s873_s27 = scalar_lea.vmem %s165_s30, 256  ;;  %p1302_p0 = pmov %p1301_p2 }
  0x52   : > { %p874_p12 = scmp.ne.s32.totalorder %s165_s30, %s873_s27  ;;  %p881_p1 = scmp.lt.s32.totalorder %s165_s30, %s165_s30 }
  0x53   : > { %p882_p13 = scmp.lt.s32.totalorder %s873_s27, %s873_s27 }
  0x54   : > { %p876_p3 = pnand %p874_p12, %p1302_p0 }
  0x55   : > { %p883_p11 = por %p882_p13, %p881_p1 }
  0x56   : > { %p877_p7 = pneg %p876_p3 }
  0x58   : > { %p884_p2 = pnand %p883_p11, %p877_p7 }
  0x5a   : > { %887 = shalt.err (!%p884_p2)
}
  0x5b   : > { %744 = dma.hbm_to_vmem [thread:$0]  (!%p1070_p8), %s1288_s3, 256, %s165_s30, [#allocation7], %s997_s10, %s997_s10, %s998_s11  }
  0x5c   : > { %s888_s22 = scalar_lea.hbm %s1132_s8, 256  ;;  %p1303_p4 = scmp.ne.s32.totalorder %s1300_s26, 0 }
  0x5d   : > { %p889_p10 = scmp.ne.s32.totalorder %s1132_s8, %s888_s22  ;;  %s893_s23 = scalar_lea.hbm %s1287_s2, 2048 }
  0x5e   : > { %p1304_p13 = pneg %p1303_p4  ;;  %p894_p6 = scmp.lt.u32.totalorder %s1132_s8, %s1287_s2 }
  0x5f   : > { %p895_p9 = scmp.lt.u32.totalorder %s893_s23, %s888_s22  ;;  %p897_p0 = scmp.lt.u32.totalorder %s888_s22, %s1132_s8 }
  0x60   : > { %p891_p11 = pnand %p889_p10, %p1304_p13 }
  0x61   : > { %p896_p12 = por %p895_p9, %p894_p6 }
  0x62   : > { %p892_p5 = pneg %p891_p11 }
  0x63   : > { %p898_p3 = por %p897_p0, %p896_p12 }
  0x65   : > { %p899_p7 = pnand %p898_p3, %p892_p5 }
  0x67   : > { %902 = shalt.err (!%p899_p7)
}
  0x68   : > { %s903_s30 = scalar_lea.vmem %s1166_s13, 256  ;;  %p1305_p1 = pmov %p1304_p13 }
  0x69   : > { %p904_p8 = scmp.ne.s32.totalorder %s1166_s13, %s903_s30  ;;  %s1001_s18 = smov [#allocation8]  }
  0x6a   : > { %s908_s6 = sshll.u32 %s1001_s18, 4  ;;  %s909_s6 = int_to_ptr.vmem [resolvable:$false] %s908_s6 }
  0x6b   : > { %p906_p2 = pnand %p904_p8, %p1305_p1  ;;  %s910_s28 = scalar_lea.vmem %s909_s6, 512 }
  0x6c   : > { %p911_p13 = scmp.lt.s32.totalorder %s1166_s13, %s909_s6  ;;  %p912_p11 = scmp.lt.s32.totalorder %s910_s28, %s903_s30 }
  0x6d   : > { %p907_p10 = pneg %p906_p2 }
  0x6e   : > { %p913_p6 = por %p912_p11, %p911_p13 }
  0x70   : > { %p914_p9 = pnand %p913_p6, %p907_p10 }
  0x72   : > { %917 = shalt.err (!%p914_p9)
}
  0x73   : > { %751 = dma.hbm_to_vmem [thread:$0]  (!%p1303_p4), %s1132_s8, 256, %s1166_s13, %s1134_s9, %s997_s10, %s997_s10, %s998_s11  }
  0x74   : > { %p1306_p5 = scmp.ne.s32.totalorder %s1298_s21, 0 }
  0x75   : > { %s224_s27 = sand.u32 (!%p1306_p5), 1, %s1049_s19   ;;  %s226_s7 = sand.u32 (!%p1306_p5), 1, %s986_s16  }
  0x76   : > { %222 = sbr.rel (%p1306_p5) target bundleno = 845 (0x34d), region = 36  ;;  %s1222_s12 = sshll.u32 (!%p1306_p5), %s226_s7, 4 }
  0x77   : > { %s225_s22 = scalar_lea.sflag (!%p1306_p5), [#allocation4], %s224_s27  ;;  %s228_s26 = scalar_lea.vmem (!%p1306_p5), [#allocation3], %s1222_s12 }
  0x78   : > { %p1307_p12 = scmp.ne.s32.totalorder (!%p1306_p5), %s1297_s20, 0 }
  0x7d   : > { %961 = dma.done.wait (%p1307_p12), %s225_s22, 256  }
  0x7e   : > { %963 = vsyncadd (%p1307_p12), %s225_s22, 4294967040  ;;  %p1308_p4 = scmp.eq.s32.totalorder %s1049_s19, 0 }
  0x80   : > { %965 = dma.done.wait (%p1308_p4), [#allocation7], 256   ;;  %p1309_p0 = pmov %p1308_p4 }
  0x81   : > { %s241_s21 = scalar_lea.vmem [#allocation8], %s1222_s12 }
  0x82   : > { %967 = vsyncadd (%p1309_p0), [#allocation7], 4294967040 }
  0x83   : > { %969 = dma.done.wait (%p1307_p12), %s225_s22, 256  }
  0x84   : > { %971 = vsyncadd (%p1307_p12), %s225_s22, 4294967040  ;;  %p1310_p3 = pmov %p1309_p0 }
  0x85   : > { %p1311_p7 = pmov %p1309_p0 }
  0x86   : > { %973 = dma.done.wait (%p1310_p3), [#allocation7], 256  }
  0x87   : > { %975 = vsyncadd (%p1311_p7), [#allocation7], 4294967040  ;;  %p1312_p8 = scmp.ne.s32.totalorder %s1049_s19, 0 }
  0x88   : > { %v276_v0 = vld [vmem:[#allocation9] sm:$0xff] (!%p1312_p8)  ;;  %v277_v1 = vld [vmem:[#allocation9 + $0x8] sm:$0xff] (!%p1312_p8)  ;;  %v274_v2 = vld [vmem:[#allocation6] sm:$0xff] (!%p1312_p8)  ;;  %vm278_vm0 = vcmask (!%p1312_p8), 130048   ;;  %vm360_vm1 = vcmask (!%p1312_p8), 261120  }
  0x89   : > { %273 = sbr.rel (%p1312_p8) target bundleno = 357 (0x165), region = 56  ;;  %v710_v3 = vpack.c.bf16 (!%p1312_p8), %v277_v1, %v276_v0  ;;  %693 = vmatprep.mubr.msk.f32.mxu0 (!%p1312_p8), %vm278_vm0, %v274_v2  ;;  %v275_v4 = vld [vmem:[#allocation6 + $0x8] sm:$0xff] (!%p1312_p8) }
  0x8b   : > { %711 = vmatprep.subr.bf16.mxu0 (!%p1312_p8), %v710_v3 }
  0x8c   : > { %713 = vmatpush3.bf16.msra.mxu0 (!%p1312_p8), %v710_v3 }
  0x8f   : > { %694 = vmatmul.mubr.msk.f32.vlgmr.msra.gmra.mrb[0].mxu0 (!%p1312_p8), %vm278_vm0, %v275_v4 }
 0x162   : > { %v695_v5 = vpop.f32.mrb[0].mxu0 }
 0x163   : > { %362 = vst.msk [vmem:[#allocation2 + $0x8] sm:$0xff] %vm360_vm1, %v695_v5  ;;  %v351_v6 = vpop.f32.mrb[1].mxu0 }
 0x164   : > { %361 = vst.msk [vmem:[#allocation2] sm:$0xff] %vm360_vm1, %v351_v6 }
 0x165 PF: > { %v365_v7 = vld [vmem:[%s241_s21] sm:$0xff]  ;;  %v366_v8 = vld [vmem:[%s241_s21 + $0x8] sm:$0xff]  ;;  %vm367_vm2 = vcmask 130048   ;;  %v451_v12 = vld [vmem:[%s228_s26] sm:$0xff]  ;;  %vm536_vm3 = vcmask 261120   ;;  %p670_p1 = scmp.ne.s32.totalorder %s1049_s19, 7 }
 0x166   : > { %v363_v9 = vld [vmem:[#allocation6] sm:$0xff]  ;;  %v714_v10 = vpack.c.bf16 %v366_v8, %v365_v7  ;;  %v364_v11 = vld [vmem:[#allocation6 + $0x8] sm:$0xff]  ;;  %707 = vmatprep.mubr.msk.f32.mxu1 %vm367_vm2, %v451_v12 }
 0x167   : > { %700 = vmatprep.mubr.msk.f32.mxu0 %vm367_vm2, %v363_v9  ;;  %v452_v16 = vld [vmem:[%s228_s26 + $0x8] sm:$0xff] }
 0x168   : > { %715 = vmatprep.subr.bf16.mxu0 %v714_v10 }
 0x169   : > { %717 = vmatpush3.bf16.msra.mxu0 %v714_v10 }
 0x16a   : > { %v450_v17 = vld [vmem:[#allocation2 + $0x8] sm:$0xff] }
 0x16b   : > { %v449_v18 = vld [vmem:[#allocation2] sm:$0xff] }
 0x16c   : > { %701 = vmatmul.mubr.msk.f32.vlgmr.msra.gmra.mrb[0].mxu0 %vm367_vm2, %v364_v11 }
 0x23f   : > { %v702_v13 = vpop.f32.mrb[0].mxu0 }
 0x240   : > { %v440_v14 = vpop.f32.mrb[1].mxu0 }
 0x241   : > { %v718_v15 = vpack.c.bf16 %v702_v13, %v440_v14 }
 0x243   : > { %719 = vmatprep.subr.bf16.mxu1 %v718_v15 }
 0x244   : > { %721 = vmatpush3.bf16.msra.mxu1 %v718_v15 }
 0x247   : > { %708 = vmatmul.mubr.msk.f32.vlgmr.msra.gmra.mrb[0].mxu1 %vm367_vm2, %v452_v16 }
 0x318   : > { %542 = sbr.rel (%p670_p1) target bundleno = 819 (0x333), region = 60 }
 0x31a   : > { %v709_v19 = vpop.f32.mrb[0].mxu1 }
 0x31b   : > { %v535_v20 = vadd.f32 %v709_v19, %v450_v17  ;;  %v525_v21 = vpop.f32.mrb[1].mxu1 }
 0x31c   : > { %v534_v22 = vadd.f32 %v525_v21, %v449_v18 }
 0x31d   : > { %538 = vst.msk [vmem:[#allocation2 + $0x8] sm:$0xff] %vm536_vm3, %v535_v20 }
 0x31e   : > { %537 = vst.msk [vmem:[#allocation2] sm:$0xff] %vm536_vm3, %v534_v22 }
 0x324   : > { %v544_v24 = vld [vmem:[#allocation2 + $0x8] sm:$0xff] }
 0x325   : > { %v543_v23 = vld [vmem:[#allocation2] sm:$0xff] }
 0x326   : > { %798 = vtanh.f32 %v543_v23 }
 0x327   : > { %800 = vtanh.f32 %v544_v24 }
 0x330   : > { %v799_v25 = vpop.eup %798 }
 0x331   : > { %v801_v26 = vpop.eup %800  ;;  %547 = vst.msk [vmem:[#allocation10] sm:$0xff] %vm536_vm3, %v799_v25 }
 0x332   : > { %548 = vst.msk [vmem:[#allocation10 + $0x8] sm:$0xff] %vm536_vm3, %v801_v26 }
 0x333 PF: > { %p757_p2 = scmp.eq.s32.totalorder %s1049_s19, 7  ;;  %s1002_s20 = smov [#allocation10]  }
 0x334   : > { %s555_s10 = sshll.u32 %s1002_s20, 4  ;;  %s556_s10 = int_to_ptr.vmem [resolvable:$true] %s555_s10 }
 0x335   : > { %s918_s11 = scalar_lea.vmem %s556_s10, 256  ;;  %p925_p6 = scmp.lt.s32.totalorder %s556_s10, %s556_s10 }
 0x336   : > { %p919_p10 = scmp.ne.s32.totalorder %s556_s10, %s918_s11  ;;  %p926_p9 = scmp.lt.s32.totalorder %s918_s11, %s918_s11 }
 0x338   : > { %p920_p13 = pnand %p919_p10, %p757_p2  ;;  %p927_p5 = por %p926_p9, %p925_p6 }
 0x33a   : > { %p921_p11 = pneg %p920_p13 }
 0x33c   : > { %p928_p12 = pnand %p927_p5, %p921_p11 }
 0x33e   : > { %931 = shalt.err (!%p928_p12)
}
 0x33f   : > { %s932_s13 = scalar_lea.hbm %s1289_s4, 256 }
 0x340   : > { %p933_p4 = scmp.ne.s32.totalorder %s1289_s4, %s932_s13  ;;  %p938_p7 = scmp.lt.u32.totalorder %s932_s13, %s1289_s4 }
 0x342   : > { %p934_p0 = pnand %p933_p4, %p757_p2 }
 0x344   : > { %p935_p3 = pneg %p934_p0 }
 0x346   : > { %p940_p8 = pnand %p938_p7, %p935_p3 }
 0x348   : > { %943 = shalt.err (!%p940_p8)
}
 0x349   : > { %s1003_s29 = smov 128   ;;  %s1004_s30 = smov 8  }
 0x34a   : > { %735 = dma.vmem_to_hbm [thread:$0]  (%p757_p2), %s556_s10, 256, %s1289_s4, [#allocation5], %s1003_s29, %s1003_s29, %s1004_s30  }
 0x34b   : > { %977 = dma.done.wait (%p757_p2), [#allocation5], 256  }
 0x34c   : > { %979 = vsyncadd (%p757_p2), [#allocation5], 4294967040 }
 0x34d PF: > { %p16_p1 = scmp.ge.s32.totalorder %s1075_s25, 10   ;;  %s1313_s15 = smov %s986_s16 }
 0x34e   : > { %s1314_s16 = smov %s990_s17  ;;  %s1315_s17 = smov %s1110_s14 }
 0x34f   : > { %s1316_s18 = smov %s1075_s25  ;;  %18 = sbr.rel (!%p16_p1) target bundleno = 5 (0x5), region = 100 }
 0x356   :  { %571 = vsyncpa [#allocation4], 1 }
 0x357   :  { %573 = vsyncpa [#allocation4 + $0x1], 1 }
 0x358   :  { %574 = vsyncpa [#allocation7], 1 }
 0x359   :  { %575 = vsyncpa [#allocation5], 1 }
 0x35a   :  { %577 = vsyncpa [#allocation5 + $0x1], 1 }

</bundles_post_ra>
